<compile_context>
chip_gen: v7x
topology: tpu7x:2x2x1
jax: 0.10.0
libtpu: 0.0.40
codegen_flags: <defaults>
</compile_context>

<pallas_src>
import functools

import jax
import jax.numpy as jnp
from jax.experimental import pallas as pl
from jax.experimental.pallas import tpu as pltpu

LANE = 128               # padded output width of every layer's weight block
W_SLAB_ROWS = 4 * LANE   # rows   0:128 -> w1, 128:256 -> w2, 256:384 -> w3, 384:512 -> w4
B_SLAB_ROWS = 8          # rows 0..3 -> b1..b4 (one 8-row aligned f32 tile)


def _round_up(x, m):
    return ((x + m - 1) // m) * m


def mlp_kernel(w_ref, b_ref, x_ref, o_ref, *, in_dim):
    f32 = jnp.float32
    bf16 = jnp.bfloat16
    out_dim = o_ref.shape[-1]

    x = x_ref[...].astype(bf16)        # (TB, in_dim) bf16 operand for the MXU
    w1 = w_ref[0:in_dim, :]            # (in_dim, 128) bf16 (only the real rows)
    w2 = w_ref[128:256, :]             # (128, 128) bf16, zero padded beyond h1/h2
    w3 = w_ref[256:384, :]
    w4 = w_ref[384:512, :]
    b1 = b_ref[0:1, :]                 # (1, 128) f32, zero padded
    b2 = b_ref[1:2, :]
    b3 = b_ref[2:3, :]
    b4 = b_ref[3:4, :]

    # bf16 MXU operands, f32 accumulation; bias add / ReLU / tanh stay in f32.
    h = jnp.maximum(jnp.dot(x, w1, preferred_element_type=f32) + b1, 0.0)
    h = jnp.maximum(jnp.dot(h.astype(bf16), w2, preferred_element_type=f32) + b2, 0.0)
    h = jnp.maximum(jnp.dot(h.astype(bf16), w3, preferred_element_type=f32) + b3, 0.0)
    h = jnp.dot(h.astype(bf16), w4, preferred_element_type=f32) + b4
    # output scale: nn.Parameter(tensor(2.0)) * tanh(x); store only the real lanes.
    o_ref[...] = (2.0 * jnp.tanh(h[:, :out_dim])).astype(o_ref.dtype)


def pack_params(params):
    """Pack weights into one bf16 (512,128) slab and biases into one f32 (8,128) slab."""
    w1, b1, w2, b2, w3, b3, w4, b4 = params
    wslab = jnp.zeros((W_SLAB_ROWS, LANE), jnp.float32)
    for k, w in enumerate((w1, w2, w3, w4)):
        assert w.shape[0] <= LANE and w.shape[1] <= LANE
        wslab = wslab.at[k * LANE:k * LANE + w.shape[0], :w.shape[1]].set(w)
    bslab = jnp.zeros((B_SLAB_ROWS, LANE), jnp.float32)
    for k, b in enumerate((b1, b2, b3, b4)):
        bslab = bslab.at[k, :b.shape[-1]].set(b.reshape(-1))
    return wslab.astype(jnp.bfloat16), bslab


@functools.partial(jax.jit, static_argnames=("out_dim", "max_tb"))
def mlp_forward(x, w_slab, b_slab, out_dim, max_tb=1024):
    """x: (B, in_dim) float; slabs from pack_params; returns (B, out_dim) f32."""
    B, in_dim = x.shape
    # Cap the tile so compiler-internal f32 intermediates stay well under the
    # 32 MiB scoped VMEM default (matters most on v7x's 64 MiB physical VMEM).
    max_tb = max(8, (min(int(max_tb), 2048) // 8) * 8)

    b8 = _round_up(max(B, 8), 8)
    if b8 > 8:
        # At least 2 grid steps when there is enough work, so v7x's two
        # TensorCores both run under dimension_semantics=("parallel",).
        tb = min(max_tb, _round_up(pl.cdiv(b8, 2), 8))
    else:
        tb = 8
    b_pad = _round_up(B, tb)

    xf = x.astype(jnp.float32)
    if b_pad != B:
        # Pad ROWS only (zeros); padded rows produce bias-only garbage that is
        # row-independent and discarded by the final slice.
        xp = jnp.zeros((b_pad, in_dim), jnp.float32).at[:B, :].set(xf)
    else:
        xp = xf

    grid = (b_pad // tb,)
    out_padded = pl.pallas_call(
        functools.partial(mlp_kernel, in_dim=in_dim),
        out_shape=jax.ShapeDtypeStruct((b_pad, out_dim), jnp.float32),
        grid=grid,
        in_specs=[
            # Parameter slabs: constant block index -> fetched once, stay in VMEM.
            pl.BlockSpec((W_SLAB_ROWS, LANE), lambda i: (0, 0)),
            pl.BlockSpec((B_SLAB_ROWS, LANE), lambda i: (0, 0)),
            # Natural-width batch tile (last dim == full array dim).
            pl.BlockSpec((tb, in_dim), lambda i: (i, 0)),
        ],
        out_specs=pl.BlockSpec((tb, out_dim), lambda i: (i, 0)),
        compiler_params=pltpu.CompilerParams(
            dimension_semantics=("parallel",),  # megacore / v7x dual-TC sharding
        ),
    )(w_slab, b_slab, xp)
    return out_padded[:B, :]


def init_params(key, input_size, hidden_sizes, output_size):
    """Deterministic init mimicking torch.nn.Linear default (uniform +/- 1/sqrt(fan_in))."""
    dims = [input_size] + list(hidden_sizes) + [output_size]
    params = []
    for i in range(len(dims) - 1):
        fan_in, fan_out = dims[i], dims[i + 1]
        key, kw, kb = jax.random.split(key, 3)
        bound = 1.0 / jnp.sqrt(fan_in)
        # stored as (in, out) == transpose of torch's (out, in) weight
        w = jax.random.uniform(kw, (fan_in, fan_out), jnp.float32, -bound, bound)
        b = jax.random.uniform(kb, (1, fan_out), jnp.float32, -bound, bound)
        params += [w, b]
    return tuple(params)


def mlp_ref(x, params):
    w1, b1, w2, b2, w3, b3, w4, b4 = params
    p = jax.lax.Precision.HIGHEST
    h = jnp.maximum(jnp.dot(x, w1, precision=p) + b1, 0.0)
    h = jnp.maximum(jnp.dot(h, w2, precision=p) + b2, 0.0)
    h = jnp.maximum(jnp.dot(h, w3, precision=p) + b3, 0.0)
    return 2.0 * jnp.tanh(jnp.dot(h, w4, precision=p) + b4)


if __name__ == "__main__":
    key = jax.random.PRNGKey(0)
    input_size = 16
    hidden_sizes = [32, 32, 32]
    output_size = 4

    params = init_params(key, input_size, hidden_sizes, output_size)
    w_slab, b_slab = pack_params(params)

    # Tolerance vs. the f32 HIGHEST-precision reference: kernel uses bf16 MXU
    # operands (f32 accumulation), so ~1e-2-scale agreement is expected.
    TOL = 5e-2

    # Small-batch check (single grid step).
    key, kx = jax.random.split(key)
    x = jax.random.normal(kx, (8, input_size), dtype=jnp.float32)
    out = jax.block_until_ready(mlp_forward(x, w_slab, b_slab, output_size))
    ref = mlp_ref(x, params)
    assert out.shape == (8, output_size)
    assert jnp.allclose(out, ref, atol=TOL, rtol=TOL)

    # Ragged batch check: exercises row-only padding of the final block.
    key, kx1 = jax.random.split(key)
    x1 = jax.random.normal(kx1, (13, input_size), dtype=jnp.float32)
    out1 = jax.block_until_ready(mlp_forward(x1, w_slab, b_slab, output_size))
    ref1 = mlp_ref(x1, params)
    assert out1.shape == (13, output_size)
    assert jnp.allclose(out1, ref1, atol=TOL, rtol=TOL)

    # Larger batch check: exercises the batch grid (>= 2 steps, both TCs on v7x).
    key, kx2 = jax.random.split(key)
    x2 = jax.random.normal(kx2, (384, input_size), dtype=jnp.float32)
    out2 = jax.block_until_ready(mlp_forward(x2, w_slab, b_slab, output_size))
    ref2 = mlp_ref(x2, params)
    assert out2.shape == (384, output_size)
    assert jnp.allclose(out2, ref2, atol=TOL, rtol=TOL)

    print("KERNEL_OK")
</pallas_src>

<mosaic_0001>
module attributes {stable_mosaic.version = 11 : i64} {
  func.func @mlp_kernel(%arg0: i32, %arg1: memref<512x128xbf16, #tpu.memory_space<vmem>>, %arg2: memref<8x128xf32, #tpu.memory_space<vmem>>, %arg3: memref<8x16xf32, #tpu.memory_space<vmem>>, %arg4: memref<8x4xf32, #tpu.memory_space<vmem>>) attributes {dimension_semantics = [#tpu.dimension_semantics<parallel>], iteration_bounds = array<i64: 1>, scalar_prefetch = 0 : i64, scratch_operands = 0 : i64, tpu.core_type = #tpu.core_type<tc>, window_params = [{pipeline_mode = #tpu.pipeline_mode<synchronous>, transform_indices = @transform_0, window_bounds = array<i64: 512, 128>}, {pipeline_mode = #tpu.pipeline_mode<synchronous>, transform_indices = @transform_1, window_bounds = array<i64: 8, 128>}, {transform_indices = @transform_2, window_bounds = array<i64: 8, 16>}, {transform_indices = @transform_3, window_bounds = array<i64: 8, 4>}]} {
    %c0 = arith.constant 0 : index
    %c0_0 = arith.constant 0 : index
    %0 = vector.load %arg3[%c0, %c0_0] : memref<8x16xf32, #tpu.memory_space<vmem>>, vector<8x16xf32>
    %1 = arith.truncf %0 : vector<8x16xf32> to vector<8x16xbf16>
    %c0_1 = arith.constant 0 : index
    %c0_2 = arith.constant 0 : index
    %2 = vector.load %arg1[%c0_1, %c0_2] : memref<512x128xbf16, #tpu.memory_space<vmem>>, vector<16x128xbf16>
    %c128 = arith.constant 128 : index
    %c0_3 = arith.constant 0 : index
    %3 = vector.load %arg1[%c128, %c0_3] : memref<512x128xbf16, #tpu.memory_space<vmem>>, vector<128x128xbf16>
    %c256 = arith.constant 256 : index
    %c0_4 = arith.constant 0 : index
    %4 = vector.load %arg1[%c256, %c0_4] : memref<512x128xbf16, #tpu.memory_space<vmem>>, vector<128x128xbf16>
    %c384 = arith.constant 384 : index
    %c0_5 = arith.constant 0 : index
    %5 = vector.load %arg1[%c384, %c0_5] : memref<512x128xbf16, #tpu.memory_space<vmem>>, vector<128x128xbf16>
    %c0_6 = arith.constant 0 : index
    %c0_7 = arith.constant 0 : index
    %6 = vector.load %arg2[%c0_6, %c0_7] : memref<8x128xf32, #tpu.memory_space<vmem>>, vector<1x128xf32>
    %c1 = arith.constant 1 : index
    %c0_8 = arith.constant 0 : index
    %7 = vector.load %arg2[%c1, %c0_8] : memref<8x128xf32, #tpu.memory_space<vmem>>, vector<1x128xf32>
    %c2 = arith.constant 2 : index
    %c0_9 = arith.constant 0 : index
    %8 = vector.load %arg2[%c2, %c0_9] : memref<8x128xf32, #tpu.memory_space<vmem>>, vector<1x128xf32>
    %c3 = arith.constant 3 : index
    %c0_10 = arith.constant 0 : index
    %9 = vector.load %arg2[%c3, %c0_10] : memref<8x128xf32, #tpu.memory_space<vmem>>, vector<1x128xf32>
    %cst = arith.constant dense<0.000000e+00> : vector<8x128xf32>
    %10 = tpu.matmul %1, %2, %cst {dimension_numbers = #tpu.dot_dimension_numbers<[1], [0], [0], [1], [0, 0, 1, 1], [], []>} : vector<8x16xbf16>, vector<16x128xbf16>, vector<8x128xf32> -> vector<8x128xf32>
    %11 = vector.broadcast %6 : vector<1x128xf32> to vector<8x128xf32>
    %12 = arith.addf %10, %11 : vector<8x128xf32>
    %cst_11 = arith.constant 0.000000e+00 : f32
    %13 = vector.broadcast %cst_11 : f32 to vector<8x128xf32>
    %14 = arith.maximumf %12, %13 : vector<8x128xf32>
    %15 = arith.truncf %14 : vector<8x128xf32> to vector<8x128xbf16>
    %cst_12 = arith.constant dense<0.000000e+00> : vector<8x128xf32>
    %16 = tpu.matmul %15, %3, %cst_12 {dimension_numbers = #tpu.dot_dimension_numbers<[1], [0], [0], [1], [0, 0, 1, 1], [], []>} : vector<8x128xbf16>, vector<128x128xbf16>, vector<8x128xf32> -> vector<8x128xf32>
    %17 = vector.broadcast %7 : vector<1x128xf32> to vector<8x128xf32>
    %18 = arith.addf %16, %17 : vector<8x128xf32>
    %cst_13 = arith.constant 0.000000e+00 : f32
    %19 = vector.broadcast %cst_13 : f32 to vector<8x128xf32>
    %20 = arith.maximumf %18, %19 : vector<8x128xf32>
    %21 = arith.truncf %20 : vector<8x128xf32> to vector<8x128xbf16>
    %cst_14 = arith.constant dense<0.000000e+00> : vector<8x128xf32>
    %22 = tpu.matmul %21, %4, %cst_14 {dimension_numbers = #tpu.dot_dimension_numbers<[1], [0], [0], [1], [0, 0, 1, 1], [], []>} : vector<8x128xbf16>, vector<128x128xbf16>, vector<8x128xf32> -> vector<8x128xf32>
    %23 = vector.broadcast %8 : vector<1x128xf32> to vector<8x128xf32>
    %24 = arith.addf %22, %23 : vector<8x128xf32>
    %cst_15 = arith.constant 0.000000e+00 : f32
    %25 = vector.broadcast %cst_15 : f32 to vector<8x128xf32>
    %26 = arith.maximumf %24, %25 : vector<8x128xf32>
    %27 = arith.truncf %26 : vector<8x128xf32> to vector<8x128xbf16>
    %cst_16 = arith.constant dense<0.000000e+00> : vector<8x128xf32>
    %28 = tpu.matmul %27, %5, %cst_16 {dimension_numbers = #tpu.dot_dimension_numbers<[1], [0], [0], [1], [0, 0, 1, 1], [], []>} : vector<8x128xbf16>, vector<128x128xbf16>, vector<8x128xf32> -> vector<8x128xf32>
    %29 = vector.broadcast %9 : vector<1x128xf32> to vector<8x128xf32>
    %30 = arith.addf %28, %29 : vector<8x128xf32>
    %31 = vector.extract_strided_slice %30 {offsets = [0, 0], sizes = [8, 4], strides = [1, 1]} : vector<8x128xf32> to vector<8x4xf32>
    %32 = math.tanh %31 : vector<8x4xf32>
    %cst_17 = arith.constant 2.000000e+00 : f32
    %33 = vector.broadcast %cst_17 : f32 to vector<8x4xf32>
    %34 = arith.mulf %33, %32 : vector<8x4xf32>
    %c0_18 = arith.constant 0 : index
    %c0_19 = arith.constant 0 : index
    %35 = vector.load %arg4[%c0_18, %c0_19] : memref<8x4xf32, #tpu.memory_space<vmem>>, vector<8x4xf32>
    tpu.vector_store %arg4[%c0_18, %c0_19], %34 {strides = array<i32>} : memref<8x4xf32, #tpu.memory_space<vmem>>, vector<8x4xf32>,
    return
  }
  func.func @transform_0(%arg0: i32) -> (i32, i32) {
    %c0_i32 = arith.constant 0 : i32
    %c0_i32_0 = arith.constant 0 : i32
    %c0_i32_1 = arith.constant 0 : i32
    return %c0_i32, %c0_i32_0 : i32, i32
  }
  func.func @transform_1(%arg0: i32) -> (i32, i32) {
    %c0_i32 = arith.constant 0 : i32
    %c0_i32_0 = arith.constant 0 : i32
    %c0_i32_1 = arith.constant 0 : i32
    return %c0_i32, %c0_i32_0 : i32, i32
  }
  func.func @transform_2(%arg0: i32) -> (i32, i32) {
    %c0_i32 = arith.constant 0 : i32
    %c0_i32_0 = arith.constant 0 : i32
    return %arg0, %c0_i32 : i32, i32
  }
  func.func @transform_3(%arg0: i32) -> (i32, i32) {
    %c0_i32 = arith.constant 0 : i32
    %c0_i32_0 = arith.constant 0 : i32
    return %arg0, %c0_i32 : i32, i32
  }
}

</mosaic_0001>

<bundles_post_ra>
// kernel: mlp_forward.1
= control target key start
LH: loop header
LB: loop body
LE: loop exit
PB: predicated region body
PF: predicated region fallthrough
CT: control target
= control target key end

     0   :  { %8 = vsyncpa [#allocation3], 0  ;;  %s789_s0 = inlined_call_operand.hbm [shape: bf16[512,128], index: 0, kind: input, shape index: {}]   ;;  %s790_s1 = inlined_call_operand.hbm [shape: f32[8,128], index: 1, kind: input, shape index: {}]   ;;  %s791_s2 = inlined_call_operand.hbm [shape: f32[8,16], index: 2, kind: input, shape index: {}]   ;;  %s792_s3 = inlined_call_operand.vmem [shape: f32[8,4], index: 3, kind: output, shape index: {}]  }
   0x1   :  { %9 = vsyncpa [#allocation5], 0  ;;  %s683_s12 = smov [#allocation4]   ;;  %s684_s14 = smov [#allocation2]  }
   0x2   :  { %s28_s13 = sshll.u32 %s683_s12, 4  ;;  %s15_s15 = sshll.u32 %s684_s14, 4  ;;  %s29_s13 = int_to_ptr.vmem [resolvable:$true] %s28_s13  ;;  %s710_s15 = int_to_ptr.vmem [resolvable:$true] %s15_s15 }
   0x3   :  { %s613_s18 = scalar_lea.hbm %s790_s1, 128 }
   0x4   :  { %p614_p0 = scmp.ne.s32.totalorder %s790_s1, %s613_s18  ;;  %p617_p1 = scmp.lt.u32.totalorder %s613_s18, %s790_s1 }
   0x6   :  { %p619_p2 = pnand %p617_p1, %p614_p0 }
   0x8   :  { %622 = shalt.err (!%p619_p2)
}
   0x9   :  { %s623_s23 = scalar_lea.vmem %s29_s13, 128  ;;  %p628_p4 = scmp.lt.s32.totalorder %s29_s13, %s29_s13 }
   0xa   :  { %p624_p3 = scmp.ne.s32.totalorder %s29_s13, %s623_s23  ;;  %p629_p5 = scmp.lt.s32.totalorder %s623_s23, %s623_s23 }
   0xc   :  { %p630_p6 = por %p629_p5, %p628_p4 }
   0xe   :  { %p631_p7 = pnand %p630_p6, %p624_p3 }
  0x10   :  { %634 = shalt.err (!%p631_p7)
}
  0x11   :  { %31 = dma.hbm_to_vmem [thread:$0]  %s790_s1, 128, %s29_s13, [#allocation5]  }
  0x12   :  { %s635_s28 = scalar_lea.hbm %s789_s0, 4096 }
  0x13   :  { %p636_p8 = scmp.ne.s32.totalorder %s789_s0, %s635_s28  ;;  %p639_p9 = scmp.lt.u32.totalorder %s635_s28, %s789_s0 }
  0x15   :  { %p641_p10 = pnand %p639_p9, %p636_p8 }
  0x17   :  { %644 = shalt.err (!%p641_p10)
}
  0x18   :  { %s645_s6 = scalar_lea.vmem %s710_s15, 4096  ;;  %p650_p12 = scmp.lt.s32.totalorder %s710_s15, %s710_s15 }
  0x19   :  { %p646_p11 = scmp.ne.s32.totalorder %s710_s15, %s645_s6  ;;  %p651_p13 = scmp.lt.s32.totalorder %s645_s6, %s645_s6 }
  0x1b   :  { %p652_p0 = por %p651_p13, %p650_p12 }
  0x1d   :  { %p653_p1 = pnand %p652_p0, %p646_p11 }
  0x1f   :  { %656 = shalt.err (!%p653_p1)
}
  0x20   :  { %s685_s1 = smov 64   ;;  %s686_s7 = smov 4  }
  0x21   :  { %21 = dma.hbm_to_vmem [thread:$0]  %s789_s0, 4096, %s710_s15, [#allocation3], %s685_s1, %s685_s1, %s686_s7  }
  0x22   :  { %s687_s10 = smov [#allocation6]   ;;  %s657_s14 = scalar_lea.hbm %s791_s2, 128 }
  0x23   :  { %s38_s11 = sshll.u32 %s687_s10, 4  ;;  %p658_p2 = scmp.ne.s32.totalorder %s791_s2, %s657_s14  ;;  %s39_s11 = int_to_ptr.vmem [resolvable:$true] %s38_s11 }
  0x24   :  { %p661_p3 = scmp.lt.u32.totalorder %s657_s14, %s791_s2 }
  0x26   :  { %p663_p4 = pnand %p661_p3, %p658_p2 }
  0x28   :  { %666 = shalt.err (!%p663_p4)
}
  0x29   :  { %s667_s20 = scalar_lea.vmem %s39_s11, 128  ;;  %p672_p6 = scmp.lt.s32.totalorder %s39_s11, %s39_s11 }
  0x2a   :  { %p668_p5 = scmp.ne.s32.totalorder %s39_s11, %s667_s20  ;;  %p673_p7 = scmp.lt.s32.totalorder %s667_s20, %s667_s20 }
  0x2c   :  { %p674_p8 = por %p673_p7, %p672_p6 }
  0x2e   :  { %p675_p9 = pnand %p674_p8, %p668_p5 }
  0x30   :  { %678 = shalt.err (!%p675_p9)
}
  0x31   :  { %41 = dma.hbm_to_vmem [thread:$0]  %s791_s2, 128, %s39_s11, [#allocation5]  }
  0x32   :  { %679 = dma.done.wait [#allocation3], 4096  }
  0x33   :  { %680 = vsyncadd [#allocation3], 4294963200 }
  0x34   :  { %681 = dma.done.wait [#allocation5], 256  }
  0x35   :  { %682 = vsyncadd [#allocation5], 4294967040  ;;  %v688_v0 = vmov 0.0   ;;  %vm689_vm0 = vmmov 0   ;;  %v586_v1 = vld [vmem:[#allocation2] sm:$0xff]   ;;  %v52_v2 = vld [vmem:[#allocation6] sm:$0xff] }
  0x36   :  { %513 = vmatprep.subr.bf16.mxu0 %v688_v0  ;;  %515 = vmatprep.mubr.msk.bf16.mxu0 %vm689_vm0, %v688_v0  ;;  %v53_v3 = vpack.c.bf16 %v52_v2, %v52_v2  ;;  %vm118_vm1 = vcmask 130048   ;;  %v587_v4 = vld [vmem:[#allocation2 + $0x40] sm:$0xff]   ;;  %v588_v5 = vld [vmem:[#allocation2 + $0x48] sm:$0xff]   ;;  %v589_v6 = vld [vmem:[#allocation2 + $0x50] sm:$0xff]   ;;  %vm446_vm2 = vcmask 31744  }
  0x37   :  { %519 = vmatprep.subr.bf16.mxu1 %v688_v0  ;;  %535 = vmatprep.mubr.msk.bf16.mxu1 %vm689_vm0, %v688_v0  ;;  %v590_v7 = vld [vmem:[#allocation2 + $0x58] sm:$0xff]   ;;  %v591_v8 = vld [vmem:[#allocation2 + $0x60] sm:$0xff]   ;;  %v592_v9 = vld [vmem:[#allocation2 + $0x68] sm:$0xff]  }
  0x38   :  { %514 = vmatpush3.bf16.msra.mxu0 %v586_v1  ;;  %520 = vmatpush3.bf16.msra.mxu1 %v587_v4  ;;  %v593_v10 = vld [vmem:[#allocation2 + $0x70] sm:$0xff]   ;;  %v594_v11 = vld [vmem:[#allocation2 + $0x78] sm:$0xff]   ;;  %v595_v12 = vld [vmem:[#allocation2 + $0x80] sm:$0xff]  }
  0x39   :  { %539 = vmatprep.subr.bf16.mxu0 %v688_v0  ;;  %521 = vmatprep.subr.bf16.mxu1 %v688_v0  ;;  %v596_v13 = vld [vmem:[#allocation2 + $0x88] sm:$0xff]   ;;  %v597_v14 = vld [vmem:[#allocation2 + $0x90] sm:$0xff]   ;;  %v598_v15 = vld [vmem:[#allocation2 + $0x98] sm:$0xff]  }
  0x3a   :  { %v599_v16 = vld [vmem:[#allocation2 + $0xa0] sm:$0xff]   ;;  %v600_v17 = vld [vmem:[#allocation2 + $0xa8] sm:$0xff]   ;;  %v601_v26 = vld [vmem:[#allocation2 + $0xb0] sm:$0xff]  }
  0x3b   :  { %516 = vmatmul.mubr.msk.bf16.vlgmr.msra.gmra.mrb[0].mxu0 %vm118_vm1, %v53_v3  ;;  %v454_v18 = vld [vmem:[#allocation4] ss:$0 sm:$0xff]  ;;  %v602_v27 = vld [vmem:[#allocation2 + $0xb8] sm:$0xff]   ;;  %v604_v29 = vld [vmem:[#allocation2 + $0xc8] sm:$0xff]  }
  0x3c   :  { %555 = vmatprep.mubr.msk.bf16.mxu0 %vm689_vm0, %v688_v0  ;;  %522 = vmatpush3.bf16.msra.mxu1 %v588_v5  ;;  %v603_v28 = vld [vmem:[#allocation2 + $0xc0] sm:$0xff]   ;;  %v605_v30 = vld [vmem:[#allocation2 + $0xd0] sm:$0xff]   ;;  %v606_v31 = vld [vmem:[#allocation2 + $0xd8] sm:$0xff]  }
  0x3d   :  { %523 = vmatprep.subr.bf16.mxu1 %v688_v0  ;;  %540 = vmatpush3.bf16.msra.mxu0 %v595_v12  ;;  %v607_v32 = vld [vmem:[#allocation2 + $0xe0] sm:$0xff]   ;;  %v608_v33 = vld [vmem:[#allocation2 + $0xe8] sm:$0xff]   ;;  %v609_v42 = vld [vmem:[#allocation2 + $0xf0] sm:$0xff]  }
  0x3e   :  { %541 = vmatprep.subr.bf16.mxu0 %v688_v0  ;;  %v457_v34 = vld [vmem:[#allocation4 + $0x1] ss:$0 sm:$0xff]  ;;  %v610_v43 = vld [vmem:[#allocation2 + $0xf8] sm:$0xff]   ;;  %v466_v44 = vld [vmem:[#allocation4 + $0x2] ss:$0 sm:$0xff] }
  0x3f   :  { %v475_v52 = vld [vmem:[#allocation4 + $0x3] ss:$0 sm:$0xff] }
  0x40   :  { %524 = vmatpush3.bf16.msra.mxu1 %v589_v6 }
  0x41   :  { %525 = vmatprep.subr.bf16.mxu1 %v688_v0  ;;  %542 = vmatpush3.bf16.msra.mxu0 %v596_v13 }
  0x42   :  { %543 = vmatprep.subr.bf16.mxu0 %v688_v0 }
  0x44   :  { %526 = vmatpush3.bf16.msra.mxu1 %v590_v7 }
  0x45   :  { %527 = vmatprep.subr.bf16.mxu1 %v688_v0  ;;  %544 = vmatpush3.bf16.msra.mxu0 %v597_v14 }
  0x46   :  { %545 = vmatprep.subr.bf16.mxu0 %v688_v0 }
  0x48   :  { %528 = vmatpush3.bf16.msra.mxu1 %v591_v8 }
  0x49   :  { %529 = vmatprep.subr.bf16.mxu1 %v688_v0  ;;  %546 = vmatpush3.bf16.msra.mxu0 %v598_v15 }
  0x4a   :  { %547 = vmatprep.subr.bf16.mxu0 %v688_v0 }
  0x4c   :  { %530 = vmatpush3.bf16.msra.mxu1 %v592_v9 }
  0x4d   :  { %531 = vmatprep.subr.bf16.mxu1 %v688_v0  ;;  %548 = vmatpush3.bf16.msra.mxu0 %v599_v16 }
  0x4e   :  { %549 = vmatprep.subr.bf16.mxu0 %v688_v0 }
  0x50   :  { %532 = vmatpush3.bf16.msra.mxu1 %v593_v10 }
  0x51   :  { %533 = vmatprep.subr.bf16.mxu1 %v688_v0  ;;  %550 = vmatpush3.bf16.msra.mxu0 %v600_v17 }
  0x52   :  { %551 = vmatprep.subr.bf16.mxu0 %v688_v0 }
  0x54   :  { %534 = vmatpush3.bf16.msra.mxu1 %v594_v11 }
  0x55   :  { %559 = vmatprep.subr.bf16.mxu1 %v688_v0  ;;  %552 = vmatpush3.bf16.msra.mxu0 %v601_v26 }
  0x56   :  { %553 = vmatprep.subr.bf16.mxu0 %v688_v0 }
  0x59   :  { %554 = vmatpush3.bf16.msra.mxu0 %v602_v27 }
 0x10e   :  { %v156_v19 = vpop.f32.mrb[0].mxu0 }
 0x10f   :  { %v157_v20 = vadd.f32 %v454_v18, %v156_v19  ;;  %v517_v21 = vpop.f32.mrb[1].mxu0 }
 0x110   :  { %v159_v22 = vpop.f32.mrb[2].mxu0 }
 0x111   :  { %v162_v23 = vmax.f32 %v157_v20, 0.0  ;;  %v518_v24 = vpop.f32.mrb[3].mxu0 }
 0x113   :  { %v163_v25 = vpack.c.bf16 %v162_v23, %v162_v23 }
 0x115   :  { %536 = vmatmul.mubr.bf16.vlgmr.msra.gmra.mrb[0].mxu1 %v163_v25 }
 0x116   :  { %575 = vmatprep.mubr.msk.bf16.mxu1 %vm689_vm0, %v688_v0  ;;  %560 = vmatpush3.bf16.msra.mxu1 %v603_v28 }
 0x117   :  { %561 = vmatprep.subr.bf16.mxu1 %v688_v0 }
 0x11a   :  { %562 = vmatpush3.bf16.msra.mxu1 %v604_v29 }
 0x11b   :  { %563 = vmatprep.subr.bf16.mxu1 %v688_v0 }
 0x11e   :  { %564 = vmatpush3.bf16.msra.mxu1 %v605_v30 }
 0x11f   :  { %565 = vmatprep.subr.bf16.mxu1 %v688_v0 }
 0x122   :  { %566 = vmatpush3.bf16.msra.mxu1 %v606_v31 }
 0x123   :  { %567 = vmatprep.subr.bf16.mxu1 %v688_v0 }
 0x126   :  { %568 = vmatpush3.bf16.msra.mxu1 %v607_v32 }
 0x127   :  { %569 = vmatprep.subr.bf16.mxu1 %v688_v0 }
 0x12a   :  { %570 = vmatpush3.bf16.msra.mxu1 %v608_v33 }
 0x12b   :  { %571 = vmatprep.subr.bf16.mxu1 %v688_v0 }
 0x12e   :  { %572 = vmatpush3.bf16.msra.mxu1 %v609_v42 }
 0x12f   :  { %573 = vmatprep.subr.bf16.mxu1 %v688_v0 }
 0x132   :  { %574 = vmatpush3.bf16.msra.mxu1 %v610_v43 }
 0x1e8   :  { %v250_v35 = vpop.f32.mrb[0].mxu1 }
 0x1e9   :  { %v251_v36 = vadd.f32 %v457_v34, %v250_v35  ;;  %v537_v37 = vpop.f32.mrb[1].mxu1 }
 0x1ea   :  { %v253_v38 = vpop.f32.mrb[2].mxu1 }
 0x1eb   :  { %v256_v39 = vmax.f32 %v251_v36, 0.0  ;;  %v538_v40 = vpop.f32.mrb[3].mxu1 }
 0x1ed   :  { %v257_v41 = vpack.c.bf16 %v256_v39, %v256_v39 }
 0x1ef   :  { %556 = vmatmul.mubr.bf16.vlgmr.msra.gmra.mrb[4].mxu0 %v257_v41 }
 0x2c2   :  { %v344_v45 = vpop.f32.mrb[4].mxu0 }
 0x2c3   :  { %v345_v46 = vadd.f32 %v466_v44, %v344_v45  ;;  %v557_v47 = vpop.f32.mrb[5].mxu0 }
 0x2c4   :  { %v347_v48 = vpop.f32.mrb[6].mxu0 }
 0x2c5   :  { %v350_v49 = vmax.f32 %v345_v46, 0.0  ;;  %v558_v50 = vpop.f32.mrb[7].mxu0 }
 0x2c7   :  { %v351_v51 = vpack.c.bf16 %v350_v49, %v350_v49 }
 0x2c9   :  { %576 = vmatmul.mubr.bf16.vlgmr.msra.gmra.mrb[4].mxu1 %v351_v51 }
 0x39c   :  { %v438_v53 = vpop.f32.mrb[4].mxu1 }
 0x39d   :  { %v439_v54 = vadd.f32 %v475_v52, %v438_v53  ;;  %v577_v55 = vpop.f32.mrb[5].mxu1 }
 0x39e   :  { %v441_v56 = vpop.f32.mrb[6].mxu1 }
 0x39f   :  { %611 = vtanh.f32 %v439_v54  ;;  %v578_v57 = vpop.f32.mrb[7].mxu1 }
 0x3a9   :  { %v612_v58 = vpop.eup %611 }
 0x3aa   :  { %v445_v59 = vmul.f32 2.0, %v612_v58 }
 0x3ac   :  { %447 = vst.msk [vmem:[%s792_s3] sm:$0xff] %vm446_vm2, %v445_v59 }
 0x3ad   :  { %452 = vsyncpa [#allocation3], 1 }
 0x3ae   :  { %453 = vsyncpa [#allocation5], 1 }

</bundles_post_ra>
